<compile_context>
chip_gen: v7x
topology: tpu7x:2x2x1
jax: 0.10.0
libtpu: 0.0.40
codegen_flags: <defaults>
</compile_context>

<pallas_src>
import jax
import jax.numpy as jnp
from jax.experimental import pallas as pl
from jax.experimental.pallas import tpu as pltpu

# Layer sizes from the PyTorch module: input_dim -> 32 -> 48 -> 24 -> 12 -> 6 -> output_dim
INPUT_DIM = 16
OUTPUT_DIM = 4
HIDDEN = (32, 48, 24, 12, 6)
NUM_LAYERS = len(HIDDEN) + 1


def _round_up(n, m):
    return ((n + m - 1) // m) * m


def _mlp_kernel(x_ref, *refs):
    """Fused forward: 6x (bf16 MXU matmul -> f32 acc -> f32 bias + ReLU), all in VMEM.

    refs = (w1, b1, w2, b2, ..., w6, b6, o_ref). Weights are bf16, biases f32.
    Activations are cast to bf16 only for the MXU input; bias/ReLU/intermediates
    stay f32 on the VPU.
    """
    o_ref = refs[-1]
    wb_refs = refs[:-1]

    h = x_ref[...]  # (TB, INPUT_DIM), bf16
    for li in range(NUM_LAYERS):
        w = wb_refs[2 * li][...]       # bf16, VMEM-resident
        b = wb_refs[2 * li + 1][...]   # f32
        acc = jnp.dot(h.astype(jnp.bfloat16), w,
                      preferred_element_type=jnp.float32)  # native bf16 MXU, f32 acc
        h = jnp.maximum(acc + b, 0.0)  # bias + ReLU in f32 (VPU)
    o_ref[...] = h.astype(o_ref.dtype)


def _choose_batch_tile(B, block_batch):
    """Pick a batch tile that (a) is a multiple of 8, (b) divides the padded batch
    with < 8 rows of waste per tile, and (c) yields >= 2 grid steps whenever B >= 16
    so the parallel batch axis can shard across both v7x TensorCores."""
    B8 = _round_up(B, 8)
    min_tiles = min(2, B8 // 8)                      # 2 tiles when the batch allows it
    n_tiles = max(pl.cdiv(B8, block_batch), min_tiles, 1)
    tb = _round_up(pl.cdiv(B8, n_tiles), 8)
    grid = pl.cdiv(B, tb)
    b_pad = grid * tb
    return tb, b_pad, grid


def simple_dnn_forward(x, params, *, block_batch=4096):
    """x: (B, INPUT_DIM) float32.  params: list of (W, b) with W (in, out), b (1, out)."""
    B = x.shape[0]
    tb, B_pad, n_tiles = _choose_batch_tile(B, block_batch)
    if B_pad != B:
        # Padded rows produce relu(b); they are sliced off below.
        x = jnp.pad(x, ((0, B_pad - B), (0, 0)))
    grid = (n_tiles,)

    # bf16 inputs/weights for the MXU; biases stay f32.
    x_cast = x.astype(jnp.bfloat16)
    params_cast = [(w.astype(jnp.bfloat16), b.astype(jnp.float32)) for w, b in params]

    flat_inputs = [x_cast]
    in_specs = [pl.BlockSpec((tb, INPUT_DIM), lambda i: (i, 0))]
    for w, b in params_cast:
        flat_inputs.append(w)
        in_specs.append(pl.BlockSpec(w.shape, lambda i: (0, 0)))  # VMEM-resident weight
        flat_inputs.append(b)
        in_specs.append(pl.BlockSpec(b.shape, lambda i: (0, 0)))  # VMEM-resident bias
    out_spec = pl.BlockSpec((tb, OUTPUT_DIM), lambda i: (i, 0))

    # Advisory cost estimate. Framing: MXU-cadence-bound; bytes are reported for
    # completeness but HBM traffic is negligible relative to compute.
    dims = (INPUT_DIM,) + HIDDEN + (OUTPUT_DIM,)
    flops = 2 * B_pad * sum(dims[i] * dims[i + 1] for i in range(NUM_LAYERS))
    param_bytes = sum(w.size * w.dtype.itemsize + b.size * b.dtype.itemsize
                      for w, b in params_cast)
    bytes_accessed = x_cast.size * 2 + B_pad * OUTPUT_DIM * 4 + param_bytes

    out = pl.pallas_call(
        _mlp_kernel,
        out_shape=jax.ShapeDtypeStruct((B_pad, OUTPUT_DIM), jnp.float32),
        grid=grid,
        in_specs=in_specs,
        out_specs=out_spec,
        compiler_params=pltpu.CompilerParams(
            dimension_semantics=("parallel",),  # megacore sharding on v7x; no-op v5e/v6e
        ),
        cost_estimate=pl.CostEstimate(
            flops=flops, transcendentals=0, bytes_accessed=bytes_accessed),
    )(*flat_inputs)

    if B_pad != B:
        out = out[:B]
    return out


def init_params(key, input_dim, output_dim):
    """Deterministic init (uniform, Kaiming-like bound), weights in (in, out) layout."""
    dims = (input_dim,) + HIDDEN + (output_dim,)
    params = []
    for i in range(len(dims) - 1):
        fan_in, fan_out = dims[i], dims[i + 1]
        key, kw, kb = jax.random.split(key, 3)
        bound = 1.0 / jnp.sqrt(fan_in)
        w = jax.random.uniform(kw, (fan_in, fan_out), jnp.float32, -bound, bound)
        b = jax.random.uniform(kb, (1, fan_out), jnp.float32, -bound, bound)
        params.append((w, b))
    return params


def reference_forward(x, params):
    """Pure-JAX reference applying the SAME quantization the kernel uses:
    bf16 matmul inputs (activations re-rounded to bf16 each layer, bf16 weights),
    f32 accumulation, f32 bias + ReLU. Final layer output stays f32."""
    h_bf16 = x.astype(jnp.bfloat16)
    h_f32 = None
    for w, b in params:
        acc = jnp.dot(h_bf16, w.astype(jnp.bfloat16),
                      preferred_element_type=jnp.float32)
        h_f32 = jnp.maximum(acc + b.astype(jnp.float32), 0.0)
        h_bf16 = h_f32.astype(jnp.bfloat16)
    return h_f32


if __name__ == "__main__":
    key = jax.random.PRNGKey(0)
    params = init_params(key, INPUT_DIM, OUTPUT_DIM)

    # Two small batches: one single-tile (grid=(1,)) and one awkward size that
    # exercises padding + the >=2-tile (megacore) path.
    for batch in (8, 19):
        key, kx = jax.random.split(key)
        x = jax.random.normal(kx, (batch, INPUT_DIM), jnp.float32)

        out = simple_dnn_forward(x, params)
        out = jax.block_until_ready(out)

        ref = reference_forward(x, params)
        assert out.shape == (batch, OUTPUT_DIM)
        assert jnp.allclose(out, ref, atol=1e-4, rtol=1e-4), (
            f"Pallas output mismatch vs reference for batch={batch}")

    print("KERNEL_OK")
</pallas_src>

<mosaic_0001>
module attributes {stable_mosaic.version = 11 : i64} {
  func.func @_mlp_kernel(%arg0: i32, %arg1: memref<8x16xbf16, #tpu.memory_space<vmem>>, %arg2: memref<16x32xbf16, #tpu.memory_space<vmem>>, %arg3: memref<1x32xf32, #tpu.memory_space<vmem>>, %arg4: memref<32x48xbf16, #tpu.memory_space<vmem>>, %arg5: memref<1x48xf32, #tpu.memory_space<vmem>>, %arg6: memref<48x24xbf16, #tpu.memory_space<vmem>>, %arg7: memref<1x24xf32, #tpu.memory_space<vmem>>, %arg8: memref<24x12xbf16, #tpu.memory_space<vmem>>, %arg9: memref<1x12xf32, #tpu.memory_space<vmem>>, %arg10: memref<12x6xbf16, #tpu.memory_space<vmem>>, %arg11: memref<1x6xf32, #tpu.memory_space<vmem>>, %arg12: memref<6x4xbf16, #tpu.memory_space<vmem>>, %arg13: memref<1x4xf32, #tpu.memory_space<vmem>>, %arg14: memref<8x4xf32, #tpu.memory_space<vmem>>) attributes {dimension_semantics = [#tpu.dimension_semantics<parallel>], iteration_bounds = array<i64: 1>, scalar_prefetch = 0 : i64, scratch_operands = 0 : i64, tpu.core_type = #tpu.core_type<tc>, window_params = [{transform_indices = @transform_0, window_bounds = array<i64: 8, 16>}, {pipeline_mode = #tpu.pipeline_mode<synchronous>, transform_indices = @transform_1, window_bounds = array<i64: 16, 32>}, {pipeline_mode = #tpu.pipeline_mode<synchronous>, transform_indices = @transform_2, window_bounds = array<i64: 1, 32>}, {pipeline_mode = #tpu.pipeline_mode<synchronous>, transform_indices = @transform_3, window_bounds = array<i64: 32, 48>}, {pipeline_mode = #tpu.pipeline_mode<synchronous>, transform_indices = @transform_4, window_bounds = array<i64: 1, 48>}, {pipeline_mode = #tpu.pipeline_mode<synchronous>, transform_indices = @transform_5, window_bounds = array<i64: 48, 24>}, {pipeline_mode = #tpu.pipeline_mode<synchronous>, transform_indices = @transform_6, window_bounds = array<i64: 1, 24>}, {pipeline_mode = #tpu.pipeline_mode<synchronous>, transform_indices = @transform_7, window_bounds = array<i64: 24, 12>}, {pipeline_mode = #tpu.pipeline_mode<synchronous>, transform_indices = @transform_8, window_bounds = array<i64: 1, 12>}, {pipeline_mode = #tpu.pipeline_mode<synchronous>, transform_indices = @transform_9, window_bounds = array<i64: 12, 6>}, {pipeline_mode = #tpu.pipeline_mode<synchronous>, transform_indices = @transform_10, window_bounds = array<i64: 1, 6>}, {pipeline_mode = #tpu.pipeline_mode<synchronous>, transform_indices = @transform_11, window_bounds = array<i64: 6, 4>}, {pipeline_mode = #tpu.pipeline_mode<synchronous>, transform_indices = @transform_12, window_bounds = array<i64: 1, 4>}, {transform_indices = @transform_13, window_bounds = array<i64: 8, 4>}]} {
    %c0 = arith.constant 0 : index
    %c0_0 = arith.constant 0 : index
    %0 = vector.load %arg1[%c0, %c0_0] : memref<8x16xbf16, #tpu.memory_space<vmem>>, vector<8x16xbf16>
    %c0_1 = arith.constant 0 : index
    %c0_2 = arith.constant 0 : index
    %1 = vector.load %arg2[%c0_1, %c0_2] : memref<16x32xbf16, #tpu.memory_space<vmem>>, vector<16x32xbf16>
    %c0_3 = arith.constant 0 : index
    %c0_4 = arith.constant 0 : index
    %2 = vector.load %arg3[%c0_3, %c0_4] : memref<1x32xf32, #tpu.memory_space<vmem>>, vector<1x32xf32>
    %cst = arith.constant dense<0.000000e+00> : vector<8x32xf32>
    %3 = tpu.matmul %0, %1, %cst {dimension_numbers = #tpu.dot_dimension_numbers<[1], [0], [0], [1], [0, 0, 1, 1], [], []>} : vector<8x16xbf16>, vector<16x32xbf16>, vector<8x32xf32> -> vector<8x32xf32>
    %4 = vector.broadcast %2 : vector<1x32xf32> to vector<8x32xf32>
    %5 = arith.addf %3, %4 : vector<8x32xf32>
    %cst_5 = arith.constant 0.000000e+00 : f32
    %6 = vector.broadcast %cst_5 : f32 to vector<8x32xf32>
    %7 = arith.maximumf %5, %6 : vector<8x32xf32>
    %c0_6 = arith.constant 0 : index
    %c0_7 = arith.constant 0 : index
    %8 = vector.load %arg4[%c0_6, %c0_7] : memref<32x48xbf16, #tpu.memory_space<vmem>>, vector<32x48xbf16>
    %c0_8 = arith.constant 0 : index
    %c0_9 = arith.constant 0 : index
    %9 = vector.load %arg5[%c0_8, %c0_9] : memref<1x48xf32, #tpu.memory_space<vmem>>, vector<1x48xf32>
    %10 = arith.truncf %7 : vector<8x32xf32> to vector<8x32xbf16>
    %cst_10 = arith.constant dense<0.000000e+00> : vector<8x48xf32>
    %11 = tpu.matmul %10, %8, %cst_10 {dimension_numbers = #tpu.dot_dimension_numbers<[1], [0], [0], [1], [0, 0, 1, 1], [], []>} : vector<8x32xbf16>, vector<32x48xbf16>, vector<8x48xf32> -> vector<8x48xf32>
    %12 = vector.broadcast %9 : vector<1x48xf32> to vector<8x48xf32>
    %13 = arith.addf %11, %12 : vector<8x48xf32>
    %cst_11 = arith.constant 0.000000e+00 : f32
    %14 = vector.broadcast %cst_11 : f32 to vector<8x48xf32>
    %15 = arith.maximumf %13, %14 : vector<8x48xf32>
    %c0_12 = arith.constant 0 : index
    %c0_13 = arith.constant 0 : index
    %16 = vector.load %arg6[%c0_12, %c0_13] : memref<48x24xbf16, #tpu.memory_space<vmem>>, vector<48x24xbf16>
    %c0_14 = arith.constant 0 : index
    %c0_15 = arith.constant 0 : index
    %17 = vector.load %arg7[%c0_14, %c0_15] : memref<1x24xf32, #tpu.memory_space<vmem>>, vector<1x24xf32>
    %18 = arith.truncf %15 : vector<8x48xf32> to vector<8x48xbf16>
    %cst_16 = arith.constant dense<0.000000e+00> : vector<8x24xf32>
    %19 = tpu.matmul %18, %16, %cst_16 {dimension_numbers = #tpu.dot_dimension_numbers<[1], [0], [0], [1], [0, 0, 1, 1], [], []>} : vector<8x48xbf16>, vector<48x24xbf16>, vector<8x24xf32> -> vector<8x24xf32>
    %20 = vector.broadcast %17 : vector<1x24xf32> to vector<8x24xf32>
    %21 = arith.addf %19, %20 : vector<8x24xf32>
    %cst_17 = arith.constant 0.000000e+00 : f32
    %22 = vector.broadcast %cst_17 : f32 to vector<8x24xf32>
    %23 = arith.maximumf %21, %22 : vector<8x24xf32>
    %c0_18 = arith.constant 0 : index
    %c0_19 = arith.constant 0 : index
    %24 = vector.load %arg8[%c0_18, %c0_19] : memref<24x12xbf16, #tpu.memory_space<vmem>>, vector<24x12xbf16>
    %c0_20 = arith.constant 0 : index
    %c0_21 = arith.constant 0 : index
    %25 = vector.load %arg9[%c0_20, %c0_21] : memref<1x12xf32, #tpu.memory_space<vmem>>, vector<1x12xf32>
    %26 = arith.truncf %23 : vector<8x24xf32> to vector<8x24xbf16>
    %cst_22 = arith.constant dense<0.000000e+00> : vector<8x12xf32>
    %27 = tpu.matmul %26, %24, %cst_22 {dimension_numbers = #tpu.dot_dimension_numbers<[1], [0], [0], [1], [0, 0, 1, 1], [], []>} : vector<8x24xbf16>, vector<24x12xbf16>, vector<8x12xf32> -> vector<8x12xf32>
    %28 = vector.broadcast %25 : vector<1x12xf32> to vector<8x12xf32>
    %29 = arith.addf %27, %28 : vector<8x12xf32>
    %cst_23 = arith.constant 0.000000e+00 : f32
    %30 = vector.broadcast %cst_23 : f32 to vector<8x12xf32>
    %31 = arith.maximumf %29, %30 : vector<8x12xf32>
    %c0_24 = arith.constant 0 : index
    %c0_25 = arith.constant 0 : index
    %32 = vector.load %arg10[%c0_24, %c0_25] : memref<12x6xbf16, #tpu.memory_space<vmem>>, vector<12x6xbf16>
    %c0_26 = arith.constant 0 : index
    %c0_27 = arith.constant 0 : index
    %33 = vector.load %arg11[%c0_26, %c0_27] : memref<1x6xf32, #tpu.memory_space<vmem>>, vector<1x6xf32>
    %34 = arith.truncf %31 : vector<8x12xf32> to vector<8x12xbf16>
    %cst_28 = arith.constant dense<0.000000e+00> : vector<8x6xf32>
    %35 = tpu.matmul %34, %32, %cst_28 {dimension_numbers = #tpu.dot_dimension_numbers<[1], [0], [0], [1], [0, 0, 1, 1], [], []>} : vector<8x12xbf16>, vector<12x6xbf16>, vector<8x6xf32> -> vector<8x6xf32>
    %36 = vector.broadcast %33 : vector<1x6xf32> to vector<8x6xf32>
    %37 = arith.addf %35, %36 : vector<8x6xf32>
    %cst_29 = arith.constant 0.000000e+00 : f32
    %38 = vector.broadcast %cst_29 : f32 to vector<8x6xf32>
    %39 = arith.maximumf %37, %38 : vector<8x6xf32>
    %c0_30 = arith.constant 0 : index
    %c0_31 = arith.constant 0 : index
    %40 = vector.load %arg12[%c0_30, %c0_31] : memref<6x4xbf16, #tpu.memory_space<vmem>>, vector<6x4xbf16>
    %c0_32 = arith.constant 0 : index
    %c0_33 = arith.constant 0 : index
    %41 = vector.load %arg13[%c0_32, %c0_33] : memref<1x4xf32, #tpu.memory_space<vmem>>, vector<1x4xf32>
    %42 = arith.truncf %39 : vector<8x6xf32> to vector<8x6xbf16>
    %cst_34 = arith.constant dense<0.000000e+00> : vector<8x4xf32>
    %43 = tpu.matmul %42, %40, %cst_34 {dimension_numbers = #tpu.dot_dimension_numbers<[1], [0], [0], [1], [0, 0, 1, 1], [], []>} : vector<8x6xbf16>, vector<6x4xbf16>, vector<8x4xf32> -> vector<8x4xf32>
    %44 = vector.broadcast %41 : vector<1x4xf32> to vector<8x4xf32>
    %45 = arith.addf %43, %44 : vector<8x4xf32>
    %cst_35 = arith.constant 0.000000e+00 : f32
    %46 = vector.broadcast %cst_35 : f32 to vector<8x4xf32>
    %47 = arith.maximumf %45, %46 : vector<8x4xf32>
    %c0_36 = arith.constant 0 : index
    %c0_37 = arith.constant 0 : index
    %48 = vector.load %arg14[%c0_36, %c0_37] : memref<8x4xf32, #tpu.memory_space<vmem>>, vector<8x4xf32>
    tpu.vector_store %arg14[%c0_36, %c0_37], %47 {strides = array<i32>} : memref<8x4xf32, #tpu.memory_space<vmem>>, vector<8x4xf32>,
    return
  }
  func.func @transform_0(%arg0: i32) -> (i32, i32) {
    %c0_i32 = arith.constant 0 : i32
    %c0_i32_0 = arith.constant 0 : i32
    return %arg0, %c0_i32 : i32, i32
  }
  func.func @transform_1(%arg0: i32) -> (i32, i32) {
    %c0_i32 = arith.constant 0 : i32
    %c0_i32_0 = arith.constant 0 : i32
    %c0_i32_1 = arith.constant 0 : i32
    return %c0_i32, %c0_i32_0 : i32, i32
  }
  func.func @transform_2(%arg0: i32) -> (i32, i32) {
    %c0_i32 = arith.constant 0 : i32
    %c0_i32_0 = arith.constant 0 : i32
    %c0_i32_1 = arith.constant 0 : i32
    return %c0_i32, %c0_i32_0 : i32, i32
  }
  func.func @transform_3(%arg0: i32) -> (i32, i32) {
    %c0_i32 = arith.constant 0 : i32
    %c0_i32_0 = arith.constant 0 : i32
    %c0_i32_1 = arith.constant 0 : i32
    return %c0_i32, %c0_i32_0 : i32, i32
  }
  func.func @transform_4(%arg0: i32) -> (i32, i32) {
    %c0_i32 = arith.constant 0 : i32
    %c0_i32_0 = arith.constant 0 : i32
    %c0_i32_1 = arith.constant 0 : i32
    return %c0_i32, %c0_i32_0 : i32, i32
  }
  func.func @transform_5(%arg0: i32) -> (i32, i32) {
    %c0_i32 = arith.constant 0 : i32
    %c0_i32_0 = arith.constant 0 : i32
    %c0_i32_1 = arith.constant 0 : i32
    return %c0_i32, %c0_i32_0 : i32, i32
  }
  func.func @transform_6(%arg0: i32) -> (i32, i32) {
    %c0_i32 = arith.constant 0 : i32
    %c0_i32_0 = arith.constant 0 : i32
    %c0_i32_1 = arith.constant 0 : i32
    return %c0_i32, %c0_i32_0 : i32, i32
  }
  func.func @transform_7(%arg0: i32) -> (i32, i32) {
    %c0_i32 = arith.constant 0 : i32
    %c0_i32_0 = arith.constant 0 : i32
    %c0_i32_1 = arith.constant 0 : i32
    return %c0_i32, %c0_i32_0 : i32, i32
  }
  func.func @transform_8(%arg0: i32) -> (i32, i32) {
    %c0_i32 = arith.constant 0 : i32
    %c0_i32_0 = arith.constant 0 : i32
    %c0_i32_1 = arith.constant 0 : i32
    return %c0_i32, %c0_i32_0 : i32, i32
  }
  func.func @transform_9(%arg0: i32) -> (i32, i32) {
    %c0_i32 = arith.constant 0 : i32
    %c0_i32_0 = arith.constant 0 : i32
    %c0_i32_1 = arith.constant 0 : i32
    return %c0_i32, %c0_i32_0 : i32, i32
  }
  func.func @transform_10(%arg0: i32) -> (i32, i32) {
    %c0_i32 = arith.constant 0 : i32
    %c0_i32_0 = arith.constant 0 : i32
    %c0_i32_1 = arith.constant 0 : i32
    return %c0_i32, %c0_i32_0 : i32, i32
  }
  func.func @transform_11(%arg0: i32) -> (i32, i32) {
    %c0_i32 = arith.constant 0 : i32
    %c0_i32_0 = arith.constant 0 : i32
    %c0_i32_1 = arith.constant 0 : i32
    return %c0_i32, %c0_i32_0 : i32, i32
  }
  func.func @transform_12(%arg0: i32) -> (i32, i32) {
    %c0_i32 = arith.constant 0 : i32
    %c0_i32_0 = arith.constant 0 : i32
    %c0_i32_1 = arith.constant 0 : i32
    return %c0_i32, %c0_i32_0 : i32, i32
  }
  func.func @transform_13(%arg0: i32) -> (i32, i32) {
    %c0_i32 = arith.constant 0 : i32
    %c0_i32_0 = arith.constant 0 : i32
    return %arg0, %c0_i32 : i32, i32
  }
}

</mosaic_0001>

<bundles_post_ra>
// kernel: tpu_custom_call.1
= control target key start
LH: loop header
LB: loop body
LE: loop exit
PB: predicated region body
PF: predicated region fallthrough
CT: control target
= control target key end

     0   :  { %v541_v0 = vmov 0.0   ;;  %vm542_vm0 = vmmov 0   ;;  %vm61_vm1 = vcmask 130048   ;;  %vm130_vm2 = vcmask 261120   ;;  %s689_s1 = inlined_call_operand.vmem [shape: bf16[16,32], index: 1, kind: input, shape index: {}]   ;;  %s690_s0 = inlined_call_operand.vmem [shape: bf16[8,16], index: 0, kind: input, shape index: {}]   ;;  %s691_s3 = inlined_call_operand.vmem [shape: bf16[32,48], index: 3, kind: input, shape index: {}]   ;;  %s692_s5 = inlined_call_operand.vmem [shape: bf16[48,24], index: 5, kind: input, shape index: {}]   ;;  %s693_s2 = inlined_call_operand.vmem [shape: f32[1,32], index: 2, kind: input, shape index: {}]   ;;  %s694_s7 = inlined_call_operand.vmem [shape: bf16[24,12], index: 7, kind: input, shape index: {}]   ;;  %s695_s4 = inlined_call_operand.vmem [shape: f32[1,48], index: 4, kind: input, shape index: {}]   ;;  %s696_s9 = inlined_call_operand.vmem [shape: bf16[12,6], index: 9, kind: input, shape index: {}]   ;;  %s697_s6 = inlined_call_operand.vmem [shape: f32[1,24], index: 6, kind: input, shape index: {}]   ;;  %s698_s11 = inlined_call_operand.vmem [shape: bf16[6,4], index: 11, kind: input, shape index: {}]   ;;  %s699_s8 = inlined_call_operand.vmem [shape: f32[1,12], index: 8, kind: input, shape index: {}]   ;;  %s700_s10 = inlined_call_operand.vmem [shape: f32[1,6], index: 10, kind: input, shape index: {}]   ;;  %s701_s12 = inlined_call_operand.vmem [shape: f32[1,4], index: 12, kind: input, shape index: {}]   ;;  %s702_s13 = inlined_call_operand.vmem [shape: f32[8,4], index: 13, kind: output, shape index: {}]  }
   0x1   :  { %486 = vmatprep.subr.bf16.mxu0 %v541_v0  ;;  %v532_v1 = vld [vmem:[%s689_s1] sm:$0xff]   ;;  %488 = vmatprep.mubr.msk.bf16.mxu0 %vm542_vm0, %v541_v0  ;;  %v534_v4 = vld [vmem:[%s691_s3 + $0x8] sm:$0xff]   ;;  %v537_v15 = vld [vmem:[%s692_s5 + $0x10] sm:$0xff]   ;;  %vm207_vm3 = vcmask 392192   ;;  %vm276_vm4 = vcmask 1043456   ;;  %vm340_vm5 = vcmask 1045504  }
   0x2   :  { %492 = vmatprep.subr.bf16.mxu1 %v541_v0  ;;  %496 = vmatprep.mubr.msk.bf16.mxu1 %vm542_vm0, %v541_v0  ;;  %v45_v2 = vld [vmem:[%s690_s0] sm:$0xf]  ;;  %v536_v14 = vld [vmem:[%s692_s5 + $0x8] sm:$0xff]   ;;  %vm272_vm6 = vcmask 195584   ;;  %vm398_vm7 = vcmask 1042432   ;;  %vm336_vm8 = vcmask 97280  }
   0x3   :  { %487 = vmatpush3.bf16.msra.mxu0 %v532_v1  ;;  %v533_v3 = vld [vmem:[%s691_s3] sm:$0xff]   ;;  %v539_v25 = vld [vmem:[%s694_s7 + $0x8] ss:$0 sps:$4 sm:$0xff]   ;;  %vm394_vm9 = vcmask 48128   ;;  %vm443_vm10 = vcmask 31744  }
   0x4   :  { %500 = vmatprep.subr.bf16.mxu0 %v541_v0  ;;  %493 = vmatpush3.bf16.msra.mxu1 %v533_v3  ;;  %v535_v5 = vld [vmem:[%s692_s5] sm:$0xff]   ;;  %v278_v26 = vsel %vm276_vm4, %v539_v25, 0 }
   0x5   :  { %494 = vmatprep.subr.bf16.mxu1 %v541_v0  ;;  %v449_v6 = vld [vmem:[%s693_s2] ss:$0 sm:$0xff] }
   0x6   :  { %489 = vmatmul.mubr.msk.bf16.vlgmr.msra.gmra.mrb[0].mxu0 %vm61_vm1, %v45_v2  ;;  %v538_v16 = vld [vmem:[%s694_s7] sm:$0xff]  }
   0x7   :  { %506 = vmatprep.mubr.msk.bf16.mxu0 %vm542_vm0, %v541_v0  ;;  %501 = vmatpush3.bf16.msra.mxu0 %v535_v5  ;;  %v452_v17 = vld [vmem:[%s695_s4] ss:$0 sm:$0xff] }
   0x8   :  { %495 = vmatpush3.bf16.msra.mxu1 %v534_v4  ;;  %502 = vmatprep.subr.bf16.mxu0 %v541_v0  ;;  %v540_v27 = vld [vmem:[%s696_s9] sm:$0x3f]  }
   0x9   :  { %510 = vmatprep.subr.bf16.mxu1 %v541_v0  ;;  %v342_v28 = vsel %vm340_vm5, %v540_v27, 0  ;;  %v456_v29 = vld [vmem:[%s697_s6] ss:$0 sm:$0xff] }
   0xa   :  { %v385_v37 = vld [vmem:[%s698_s11] sm:$0x7] }
   0xb   :  { %503 = vmatpush3.bf16.msra.mxu0 %v536_v14  ;;  %v400_v38 = vsel %vm398_vm7, %v385_v37, 0  ;;  %v461_v39 = vld [vmem:[%s699_s8] ss:$0 sm:$0xff] }
   0xc   :  { %504 = vmatprep.subr.bf16.mxu0 %v541_v0  ;;  %v465_v47 = vld [vmem:[%s700_s10] ss:$0 sm:$0xff] }
   0xd   :  { %v468_v55 = vld [vmem:[%s701_s12] ss:$0 sm:$0xff] }
   0xf   :  { %505 = vmatpush3.bf16.msra.mxu0 %v537_v15 }
  0x10   :  { %518 = vmatprep.subr.bf16.mxu0 %v541_v0 }
  0xd9   :  { %v99_v7 = vpop.f32.mrb[0].mxu0 }
  0xda   :  { %v100_v8 = vadd.f32 %v449_v6, %v99_v7  ;;  %v490_v9 = vpop.f32.mrb[1].mxu0 }
  0xdb   :  { %v102_v10 = vpop.f32.mrb[2].mxu0 }
  0xdc   :  { %v105_v11 = vmax.f32 %v100_v8, 0.0  ;;  %v491_v12 = vpop.f32.mrb[3].mxu0 }
  0xde   :  { %v111_v13 = vpack.c.bf16 %v105_v11, %v105_v11 }
  0xe0   :  { %497 = vmatmul.mubr.msk.bf16.vlgmr.msra.gmra.mrb[0].mxu1 %vm130_vm2, %v111_v13 }
  0xe1   :  { %514 = vmatprep.mubr.msk.bf16.mxu1 %vm542_vm0, %v541_v0  ;;  %511 = vmatpush3.bf16.msra.mxu1 %v538_v16 }
  0xe2   :  { %512 = vmatprep.subr.bf16.mxu1 %v541_v0 }
  0xe5   :  { %513 = vmatpush3.bf16.msra.mxu1 %v278_v26 }
  0xe6   :  { %524 = vmatprep.subr.bf16.mxu1 %v541_v0 }
 0x1b3   :  { %v168_v18 = vpop.f32.mrb[0].mxu1 }
 0x1b4   :  { %v169_v19 = vadd.f32 %v452_v17, %v168_v18  ;;  %v498_v20 = vpop.f32.mrb[1].mxu1 }
 0x1b5   :  { %v171_v21 = vpop.f32.mrb[2].mxu1 }
 0x1b6   :  { %v174_v22 = vmax.f32 %v169_v19, 0.0  ;;  %v499_v23 = vpop.f32.mrb[3].mxu1 }
 0x1b8   :  { %v182_v24 = vpack.c.bf16 %v174_v22, %v174_v22 }
 0x1ba   :  { %507 = vmatmul.mubr.msk.bf16.vlgmr.msra.gmra.mrb[4].mxu0 %vm207_vm3, %v182_v24 }
 0x1bb   :  { %520 = vmatprep.mubr.msk.bf16.mxu0 %vm542_vm0, %v541_v0  ;;  %519 = vmatpush3.bf16.msra.mxu0 %v342_v28 }
 0x28d   :  { %v245_v30 = vpop.f32.mrb[4].mxu0 }
 0x28e   :  { %v246_v31 = vadd.f32 %v456_v29, %v245_v30  ;;  %v508_v32 = vpop.f32.mrb[5].mxu0 }
 0x28f   :  { %v248_v33 = vpop.f32.mrb[6].mxu0 }
 0x290   :  { %v251_v34 = vmax.f32 %v246_v31, 0.0  ;;  %v509_v35 = vpop.f32.mrb[7].mxu0 }
 0x292   :  { %v256_v36 = vpack.c.bf16 %v251_v34, %v251_v34 }
 0x294   :  { %515 = vmatmul.mubr.msk.bf16.vlgmr.msra.gmra.mrb[4].mxu1 %vm272_vm6, %v256_v36 }
 0x295   :  { %526 = vmatprep.mubr.msk.bf16.mxu1 %vm542_vm0, %v541_v0  ;;  %525 = vmatpush3.bf16.msra.mxu1 %v400_v38 }
 0x367   :  { %v314_v40 = vpop.f32.mrb[4].mxu1 }
 0x368   :  { %v315_v41 = vadd.f32 %v461_v39, %v314_v40  ;;  %v516_v42 = vpop.f32.mrb[5].mxu1 }
 0x369   :  { %v317_v43 = vpop.f32.mrb[6].mxu1 }
 0x36a   :  { %v320_v44 = vmax.f32 %v315_v41, 0.0  ;;  %v517_v45 = vpop.f32.mrb[7].mxu1 }
 0x36c   :  { %v324_v46 = vpack.c.bf16 %v320_v44, %v320_v44 }
 0x36e   :  { %521 = vmatmul.mubr.msk.bf16.vlgmr.msra.gmra.mrb[8].mxu0 %vm336_vm8, %v324_v46 }
 0x441   :  { %v378_v48 = vpop.f32.mrb[8].mxu0 }
 0x442   :  { %v379_v49 = vadd.f32 %v465_v47, %v378_v48  ;;  %v522_v50 = vpop.f32.mrb[9].mxu0 }
 0x443   :  { %v381_v51 = vpop.f32.mrb[10].mxu0 }
 0x444   :  { %v384_v52 = vmax.f32 %v379_v49, 0.0  ;;  %v523_v53 = vpop.f32.mrb[11].mxu0 }
 0x446   :  { %v387_v54 = vpack.c.bf16 %v384_v52, %v384_v52 }
 0x448   :  { %527 = vmatmul.mubr.msk.bf16.vlgmr.msra.gmra.mrb[8].mxu1 %vm394_vm9, %v387_v54 }
 0x51b   :  { %v436_v56 = vpop.f32.mrb[8].mxu1 }
 0x51c   :  { %v437_v57 = vadd.f32 %v468_v55, %v436_v56  ;;  %v528_v58 = vpop.f32.mrb[9].mxu1 }
 0x51d   :  { %v439_v59 = vpop.f32.mrb[10].mxu1 }
 0x51e   :  { %v442_v60 = vmax.f32 %v437_v57, 0.0  ;;  %v529_v61 = vpop.f32.mrb[11].mxu1 }
 0x520   :  { %444 = vst.msk [vmem:[%s702_s13] sm:$0xff] %vm443_vm10, %v442_v60 }

</bundles_post_ra>
